<compile_context>
chip_gen: v6e
topology: v6e:2x2x1
jax: 0.10.0
libtpu: 0.0.40
codegen_flags: <defaults>
</compile_context>

<pallas_src>
import jax
import jax.numpy as jnp
from jax.experimental import pallas as pl
from jax.experimental.pallas import tpu as pltpu


def _round_up(n, m):
    return ((n + m - 1) // m) * m


# ----------------------------------------------------------------------------
# Fused kernel: 5 x (matmul + shift + LeakyReLU) + head reduce.
#   x_ref : (TILE_B, F_PAD)          batch tile
#   w_ref : (5, F_PAD, F_PAD)        BN-scale-folded weights, VMEM-resident
#   v_ref : (8, F_PAD)               rows 0..4 = shifts, row 5 = w_out row,
#                                    row 6 lane 0 = b_out, row 7 = unused
#   o_ref : (TILE_B, 1)
# ----------------------------------------------------------------------------
def _fc_ranking_kernel(x_ref, w_ref, v_ref, o_ref):
    ns = jnp.float32(0.1)

    h = x_ref[...]
    for layer in range(5):
        z = jnp.dot(h, w_ref[layer], preferred_element_type=jnp.float32)
        z = z + v_ref[layer : layer + 1, :]          # shift (bias+BN folded)
        h = jnp.maximum(z, ns * z)                   # LeakyReLU(0.1)

    # Output head: N=1 matmul replaced by VPU multiply + lane reduction (XLU).
    w_out_row = v_ref[5:6, :]                        # (1, F_PAD)
    b_out = v_ref[6:7, 0:1]                          # (1, 1)
    out = jnp.sum(h * w_out_row, axis=-1, keepdims=True) + b_out
    # TODO(synk): (TILE_B, 1) store is lane-sparse (masked vst); a lane-dense
    # (1, TILE_B) transposed output is a second-order follow-up.
    o_ref[...] = out


# ----------------------------------------------------------------------------
# Wrapper: pad, tile the batch, keep the weight slabs resident across steps.
# ----------------------------------------------------------------------------
def fc_ranking_net_forward(x, w_slab, vec, *, tile_b=512):
    """x: (B, input_size) f32.  Returns (B,) f32."""
    B, F = x.shape
    F_PAD = w_slab.shape[-1]

    b_tile = min(tile_b, _round_up(B, 8))
    B_pad = _round_up(B, b_tile)
    x_p = jnp.zeros((B_pad, F_PAD), jnp.float32).at[:B, :F].set(x)

    grid = (B_pad // b_tile,)
    n_tiles = grid[0]

    flops = n_tiles * (2 * b_tile * F_PAD * F_PAD * 5 + 4 * b_tile * F_PAD * 5
                       + 3 * b_tile * F_PAD)
    bytes_accessed = (x_p.size + w_slab.size + vec.size + B_pad) * 4

    out = pl.pallas_call(
        _fc_ranking_kernel,
        out_shape=jax.ShapeDtypeStruct((B_pad, 1), jnp.float32),
        grid=grid,
        in_specs=[
            pl.BlockSpec((b_tile, F_PAD), lambda i: (i, 0)),         # x tile
            pl.BlockSpec((5, F_PAD, F_PAD), lambda i: (0, 0, 0)),    # weights (resident)
            pl.BlockSpec((8, F_PAD), lambda i: (0, 0)),              # shifts/head (resident)
        ],
        out_specs=pl.BlockSpec((b_tile, 1), lambda i: (i, 0)),
        compiler_params=pltpu.CompilerParams(
            dimension_semantics=("parallel",)),
        cost_estimate=pl.CostEstimate(
            flops=flops, transcendentals=0, bytes_accessed=bytes_accessed),
    )(x_p, w_slab, vec)
    return out[:B, 0]


# ----------------------------------------------------------------------------
# Deterministic raw parameters (nn.Linear / nn.BatchNorm1d shapes, with W
# stored as (in, out) = transpose of the PyTorch layout so x @ W is direct).
# ----------------------------------------------------------------------------
def make_raw_params(key, input_size, hidden_dims):
    dims = [input_size,
            hidden_dims["hidden_dim1"], hidden_dims["hidden_dim2"],
            hidden_dims["hidden_dim3"], hidden_dims["hidden_dim4"],
            hidden_dims["hidden_dim5"]]
    layers = []
    for i in range(5):
        fan_in, fan_out = dims[i], dims[i + 1]
        key, kw, kb, kg, kbe, km, kv = jax.random.split(key, 7)
        bound = 1.0 / jnp.sqrt(fan_in)
        w = jax.random.uniform(kw, (fan_in, fan_out), jnp.float32, -bound, bound)
        b = jax.random.uniform(kb, (fan_out,), jnp.float32, -bound, bound)
        gamma = 1.0 + 0.1 * jax.random.normal(kg, (fan_out,), jnp.float32)
        beta = 0.1 * jax.random.normal(kbe, (fan_out,), jnp.float32)
        mean = 0.1 * jax.random.normal(km, (fan_out,), jnp.float32)
        var = jnp.abs(1.0 + 0.1 * jax.random.normal(kv, (fan_out,), jnp.float32))
        layers.append((w, b, gamma, beta, mean, var))

    key, kwo, kbo = jax.random.split(key, 3)
    bound = 1.0 / jnp.sqrt(dims[-1])
    w_out = jax.random.uniform(kwo, (dims[-1], 1), jnp.float32, -bound, bound)
    b_out = jax.random.uniform(kbo, (1,), jnp.float32, -bound, bound)
    return {"dims": dims, "layers": layers, "w_out": w_out, "b_out": b_out}


# ----------------------------------------------------------------------------
# Fold BN (eval mode) into the weights/shifts and pack into two padded slabs:
#   w_slab: (5, F_PAD, F_PAD)   w_folded[:, j] = w[:, j] * scale[j]
#   vec   : (8, F_PAD)          rows 0..4 shifts, row 5 w_out row, row 6 b_out
# where scale = gamma / sqrt(var + eps), shift = (b - mean) * scale + beta.
# ----------------------------------------------------------------------------
def pack_params(raw, eps=1e-5):
    dims = raw["dims"]
    F_PAD = _round_up(max(dims), 128)

    w_slab = jnp.zeros((5, F_PAD, F_PAD), jnp.float32)
    vec = jnp.zeros((8, F_PAD), jnp.float32)
    for i, (w, b, gamma, beta, mean, var) in enumerate(raw["layers"]):
        scale = gamma / jnp.sqrt(var + eps)
        w_folded = w * scale[None, :]
        shift = (b - mean) * scale + beta
        w_slab = w_slab.at[i, : dims[i], : dims[i + 1]].set(w_folded)
        vec = vec.at[i, : dims[i + 1]].set(shift)

    vec = vec.at[5, : dims[5]].set(raw["w_out"][:, 0])
    vec = vec.at[6, 0].set(raw["b_out"][0])
    return w_slab, vec


# ----------------------------------------------------------------------------
# Pure-JAX reference (un-folded BN math) for a correctness check.
# ----------------------------------------------------------------------------
def reference_forward(x, raw, eps=1e-5):
    h = x
    for (w, b, gamma, beta, mean, var) in raw["layers"]:
        z = h @ w + b
        z = (z - mean) / jnp.sqrt(var + eps) * gamma + beta
        h = jnp.where(z > 0, z, 0.1 * z)
    return (h @ raw["w_out"] + raw["b_out"])[:, 0]


if __name__ == "__main__":
    key = jax.random.PRNGKey(0)
    kx, kp = jax.random.split(key)

    batch = 16
    input_size = 32
    hidden_dims = {
        "hidden_dim1": 64,
        "hidden_dim2": 64,
        "hidden_dim3": 32,
        "hidden_dim4": 32,
        "hidden_dim5": 16,
    }

    x = jax.random.normal(kx, (batch, input_size), jnp.float32)
    raw = make_raw_params(kp, input_size, hidden_dims)
    w_slab, vec = pack_params(raw)

    # TODO(synk): dropout is omitted (eval-mode identity); training-mode batch
    # statistics for BatchNorm are not reproduced (eval running stats used).
    # TODO(synk): for large-batch serving, cast x / w_slab to bf16 (keep the
    # post-matmul elementwise math in f32 for v5e).

    out = fc_ranking_net_forward(x, w_slab, vec)
    out = jax.block_until_ready(out)

    ref = reference_forward(x, raw)
    assert out.shape == (batch,)
    assert jnp.allclose(out, ref, atol=1e-4, rtol=1e-4), (out, ref)

    print("KERNEL_OK")
</pallas_src>

<mosaic_0001>
module attributes {stable_mosaic.version = 11 : i64} {
  func.func @_fc_ranking_kernel(%arg0: i32, %arg1: memref<16x128xf32, #tpu.memory_space<vmem>>, %arg2: memref<5x128x128xf32, #tpu.memory_space<vmem>>, %arg3: memref<8x128xf32, #tpu.memory_space<vmem>>, %arg4: memref<16x1xf32, #tpu.memory_space<vmem>>) attributes {dimension_semantics = [#tpu.dimension_semantics<parallel>], iteration_bounds = array<i64: 1>, scalar_prefetch = 0 : i64, scratch_operands = 0 : i64, tpu.core_type = #tpu.core_type<tc>, window_params = [{transform_indices = @transform_0, window_bounds = array<i64: 16, 128>}, {pipeline_mode = #tpu.pipeline_mode<synchronous>, transform_indices = @transform_1, window_bounds = array<i64: 5, 128, 128>}, {pipeline_mode = #tpu.pipeline_mode<synchronous>, transform_indices = @transform_2, window_bounds = array<i64: 8, 128>}, {transform_indices = @transform_3, window_bounds = array<i64: 16, 1>}]} {
    %c0 = arith.constant 0 : index
    %c0_0 = arith.constant 0 : index
    %0 = vector.load %arg1[%c0, %c0_0] : memref<16x128xf32, #tpu.memory_space<vmem>>, vector<16x128xf32>
    %c0_1 = arith.constant 0 : index
    %c0_2 = arith.constant 0 : index
    %c0_3 = arith.constant 0 : index
    %1 = vector.load %arg2[%c0_1, %c0_2, %c0_3] : memref<5x128x128xf32, #tpu.memory_space<vmem>>, vector<1x128x128xf32>
    %2 = vector.shape_cast %1 : vector<1x128x128xf32> to vector<128x128xf32>
    %cst = arith.constant dense<0.000000e+00> : vector<16x128xf32>
    %3 = tpu.matmul %0, %2, %cst {dimension_numbers = #tpu.dot_dimension_numbers<[1], [0], [0], [1], [0, 0, 1, 1], [], []>} : vector<16x128xf32>, vector<128x128xf32>, vector<16x128xf32> -> vector<16x128xf32>
    %c0_4 = arith.constant 0 : index
    %c0_5 = arith.constant 0 : index
    %4 = vector.load %arg3[%c0_4, %c0_5] : memref<8x128xf32, #tpu.memory_space<vmem>>, vector<1x128xf32>
    %5 = vector.broadcast %4 : vector<1x128xf32> to vector<16x128xf32>
    %6 = arith.addf %3, %5 : vector<16x128xf32>
    %cst_6 = arith.constant 1.000000e-01 : f32
    %7 = vector.broadcast %cst_6 : f32 to vector<16x128xf32>
    %8 = arith.mulf %7, %6 : vector<16x128xf32>
    %9 = arith.maximumf %6, %8 : vector<16x128xf32>
    %c1 = arith.constant 1 : index
    %c0_7 = arith.constant 0 : index
    %c0_8 = arith.constant 0 : index
    %10 = vector.load %arg2[%c1, %c0_7, %c0_8] : memref<5x128x128xf32, #tpu.memory_space<vmem>>, vector<1x128x128xf32>
    %11 = vector.shape_cast %10 : vector<1x128x128xf32> to vector<128x128xf32>
    %cst_9 = arith.constant dense<0.000000e+00> : vector<16x128xf32>
    %12 = tpu.matmul %9, %11, %cst_9 {dimension_numbers = #tpu.dot_dimension_numbers<[1], [0], [0], [1], [0, 0, 1, 1], [], []>} : vector<16x128xf32>, vector<128x128xf32>, vector<16x128xf32> -> vector<16x128xf32>
    %c1_10 = arith.constant 1 : index
    %c0_11 = arith.constant 0 : index
    %13 = vector.load %arg3[%c1_10, %c0_11] : memref<8x128xf32, #tpu.memory_space<vmem>>, vector<1x128xf32>
    %14 = vector.broadcast %13 : vector<1x128xf32> to vector<16x128xf32>
    %15 = arith.addf %12, %14 : vector<16x128xf32>
    %cst_12 = arith.constant 1.000000e-01 : f32
    %16 = vector.broadcast %cst_12 : f32 to vector<16x128xf32>
    %17 = arith.mulf %16, %15 : vector<16x128xf32>
    %18 = arith.maximumf %15, %17 : vector<16x128xf32>
    %c2 = arith.constant 2 : index
    %c0_13 = arith.constant 0 : index
    %c0_14 = arith.constant 0 : index
    %19 = vector.load %arg2[%c2, %c0_13, %c0_14] : memref<5x128x128xf32, #tpu.memory_space<vmem>>, vector<1x128x128xf32>
    %20 = vector.shape_cast %19 : vector<1x128x128xf32> to vector<128x128xf32>
    %cst_15 = arith.constant dense<0.000000e+00> : vector<16x128xf32>
    %21 = tpu.matmul %18, %20, %cst_15 {dimension_numbers = #tpu.dot_dimension_numbers<[1], [0], [0], [1], [0, 0, 1, 1], [], []>} : vector<16x128xf32>, vector<128x128xf32>, vector<16x128xf32> -> vector<16x128xf32>
    %c2_16 = arith.constant 2 : index
    %c0_17 = arith.constant 0 : index
    %22 = vector.load %arg3[%c2_16, %c0_17] : memref<8x128xf32, #tpu.memory_space<vmem>>, vector<1x128xf32>
    %23 = vector.broadcast %22 : vector<1x128xf32> to vector<16x128xf32>
    %24 = arith.addf %21, %23 : vector<16x128xf32>
    %cst_18 = arith.constant 1.000000e-01 : f32
    %25 = vector.broadcast %cst_18 : f32 to vector<16x128xf32>
    %26 = arith.mulf %25, %24 : vector<16x128xf32>
    %27 = arith.maximumf %24, %26 : vector<16x128xf32>
    %c3 = arith.constant 3 : index
    %c0_19 = arith.constant 0 : index
    %c0_20 = arith.constant 0 : index
    %28 = vector.load %arg2[%c3, %c0_19, %c0_20] : memref<5x128x128xf32, #tpu.memory_space<vmem>>, vector<1x128x128xf32>
    %29 = vector.shape_cast %28 : vector<1x128x128xf32> to vector<128x128xf32>
    %cst_21 = arith.constant dense<0.000000e+00> : vector<16x128xf32>
    %30 = tpu.matmul %27, %29, %cst_21 {dimension_numbers = #tpu.dot_dimension_numbers<[1], [0], [0], [1], [0, 0, 1, 1], [], []>} : vector<16x128xf32>, vector<128x128xf32>, vector<16x128xf32> -> vector<16x128xf32>
    %c3_22 = arith.constant 3 : index
    %c0_23 = arith.constant 0 : index
    %31 = vector.load %arg3[%c3_22, %c0_23] : memref<8x128xf32, #tpu.memory_space<vmem>>, vector<1x128xf32>
    %32 = vector.broadcast %31 : vector<1x128xf32> to vector<16x128xf32>
    %33 = arith.addf %30, %32 : vector<16x128xf32>
    %cst_24 = arith.constant 1.000000e-01 : f32
    %34 = vector.broadcast %cst_24 : f32 to vector<16x128xf32>
    %35 = arith.mulf %34, %33 : vector<16x128xf32>
    %36 = arith.maximumf %33, %35 : vector<16x128xf32>
    %c4 = arith.constant 4 : index
    %c0_25 = arith.constant 0 : index
    %c0_26 = arith.constant 0 : index
    %37 = vector.load %arg2[%c4, %c0_25, %c0_26] : memref<5x128x128xf32, #tpu.memory_space<vmem>>, vector<1x128x128xf32>
    %38 = vector.shape_cast %37 : vector<1x128x128xf32> to vector<128x128xf32>
    %cst_27 = arith.constant dense<0.000000e+00> : vector<16x128xf32>
    %39 = tpu.matmul %36, %38, %cst_27 {dimension_numbers = #tpu.dot_dimension_numbers<[1], [0], [0], [1], [0, 0, 1, 1], [], []>} : vector<16x128xf32>, vector<128x128xf32>, vector<16x128xf32> -> vector<16x128xf32>
    %c4_28 = arith.constant 4 : index
    %c0_29 = arith.constant 0 : index
    %40 = vector.load %arg3[%c4_28, %c0_29] : memref<8x128xf32, #tpu.memory_space<vmem>>, vector<1x128xf32>
    %41 = vector.broadcast %40 : vector<1x128xf32> to vector<16x128xf32>
    %42 = arith.addf %39, %41 : vector<16x128xf32>
    %cst_30 = arith.constant 1.000000e-01 : f32
    %43 = vector.broadcast %cst_30 : f32 to vector<16x128xf32>
    %44 = arith.mulf %43, %42 : vector<16x128xf32>
    %45 = arith.maximumf %42, %44 : vector<16x128xf32>
    %c5 = arith.constant 5 : index
    %c0_31 = arith.constant 0 : index
    %46 = vector.load %arg3[%c5, %c0_31] : memref<8x128xf32, #tpu.memory_space<vmem>>, vector<1x128xf32>
    %c6 = arith.constant 6 : index
    %c0_32 = arith.constant 0 : index
    %47 = vector.load %arg3[%c6, %c0_32] : memref<8x128xf32, #tpu.memory_space<vmem>>, vector<1x1xf32>
    %48 = vector.broadcast %46 : vector<1x128xf32> to vector<16x128xf32>
    %49 = arith.mulf %45, %48 : vector<16x128xf32>
    %cst_33 = arith.constant dense<0.000000e+00> : vector<16xf32>
    %50 = vector.multi_reduction <add>, %49, %cst_33 [1] : vector<16x128xf32> to vector<16xf32>
    %51 = vector.shape_cast %50 : vector<16xf32> to vector<16x1xf32>
    %52 = vector.broadcast %47 : vector<1x1xf32> to vector<16x1xf32>
    %53 = arith.addf %51, %52 : vector<16x1xf32>
    %c0_34 = arith.constant 0 : index
    %c0_35 = arith.constant 0 : index
    %54 = vector.load %arg4[%c0_34, %c0_35] : memref<16x1xf32, #tpu.memory_space<vmem>>, vector<16x1xf32>
    tpu.vector_store %arg4[%c0_34, %c0_35], %53 {strides = array<i32>} : memref<16x1xf32, #tpu.memory_space<vmem>>, vector<16x1xf32>,
    return
  }
  func.func @transform_0(%arg0: i32) -> (i32, i32) {
    %c0_i32 = arith.constant 0 : i32
    %c0_i32_0 = arith.constant 0 : i32
    return %arg0, %c0_i32 : i32, i32
  }
  func.func @transform_1(%arg0: i32) -> (i32, i32, i32) {
    %c0_i32 = arith.constant 0 : i32
    %c0_i32_0 = arith.constant 0 : i32
    %c0_i32_1 = arith.constant 0 : i32
    %c0_i32_2 = arith.constant 0 : i32
    return %c0_i32, %c0_i32_0, %c0_i32_1 : i32, i32, i32
  }
  func.func @transform_2(%arg0: i32) -> (i32, i32) {
    %c0_i32 = arith.constant 0 : i32
    %c0_i32_0 = arith.constant 0 : i32
    %c0_i32_1 = arith.constant 0 : i32
    return %c0_i32, %c0_i32_0 : i32, i32
  }
  func.func @transform_3(%arg0: i32) -> (i32, i32) {
    %c0_i32 = arith.constant 0 : i32
    %c0_i32_0 = arith.constant 0 : i32
    return %arg0, %c0_i32 : i32, i32
  }
}

</mosaic_0001>

<bundles_post_ra>
// kernel: tpu_custom_call.1
= control target key start
LH: loop header
LB: loop body
LE: loop exit
PB: predicated region body
PF: predicated region fallthrough
CT: control target
= control target key end

     0   :  { %8 = vsyncpa [#allocation3], 0  ;;  %s967_s0 = inlined_call_operand.hbm [shape: f32[16,128], index: 0, kind: input, shape index: {}]   ;;  %s968_s1 = inlined_call_operand.hbm [shape: f32[5,128,128], index: 1, kind: input, shape index: {}]   ;;  %s969_s2 = inlined_call_operand.hbm [shape: f32[8,128], index: 2, kind: input, shape index: {}]   ;;  %s970_s3 = inlined_call_operand.vmem [shape: f32[16,1], index: 3, kind: output, shape index: {}]  }
   0x1   :  { %9 = vsyncpa [#allocation5], 0  ;;  %s927_s12 = smov [#allocation4]   ;;  %s928_s14 = smov [#allocation2]  }
   0x2   :  { %s27_s13 = sshll.u32 %s927_s12, 4  ;;  %s15_s15 = sshll.u32 %s928_s14, 4  ;;  %s28_s13 = int_to_ptr.vmem [resolvable:$true] %s27_s13  ;;  %s16_s15 = int_to_ptr.vmem [resolvable:$true] %s15_s15 }
   0x3   :  { %s871_s16 = scalar_lea.vmem %s28_s13, 10240  ;;  %p876_p1 = scmp.lt.s32.totalorder %s28_s13, %s28_s13 }
   0x4   :  { %p872_p0 = scmp.ne.s32.totalorder %s28_s13, %s871_s16  ;;  %p877_p2 = scmp.lt.s32.totalorder %s871_s16, %s871_s16 }
   0x6   :  { %p878_p3 = por %p877_p2, %p876_p1 }
   0x8   :  { %p879_p4 = pnand %p878_p3, %p872_p0 }
   0xa   :  { %882 = shalt.err (!%p879_p4)
}
   0xb   :  { %s929_s17 = smov 128   ;;  %s930_s18 = smov 8  }
   0xc   :  { %33 = dma.hbm_to_vmem [thread:$0]  %s968_s1, 10240, %s28_s13, [#allocation5], %s929_s17, %s929_s17, %s930_s18  }
   0xd   :  { %s891_s21 = scalar_lea.vmem %s16_s15, 256  ;;  %p896_p6 = scmp.lt.s32.totalorder %s16_s15, %s16_s15 }
   0xe   :  { %p892_p5 = scmp.ne.s32.totalorder %s16_s15, %s891_s21  ;;  %p897_p7 = scmp.lt.s32.totalorder %s891_s21, %s891_s21 }
  0x10   :  { %p898_p8 = por %p897_p7, %p896_p6 }
  0x12   :  { %p899_p9 = pnand %p898_p8, %p892_p5 }
  0x14   :  { %902 = shalt.err (!%p899_p9)
}
  0x15   :  { %21 = dma.hbm_to_vmem [thread:$0]  %s967_s0, 256, %s16_s15, [#allocation3], %s929_s17, %s929_s17, %s930_s18  }
  0x16   :  { %s931_s24 = smov [#allocation6]  }
  0x17   :  { %s40_s25 = sshll.u32 %s931_s24, 4  ;;  %s41_s25 = int_to_ptr.vmem [resolvable:$true] %s40_s25 }
  0x18   :  { %s911_s26 = scalar_lea.vmem %s41_s25, 128  ;;  %p916_p11 = scmp.lt.s32.totalorder %s41_s25, %s41_s25 }
  0x19   :  { %p912_p10 = scmp.ne.s32.totalorder %s41_s25, %s911_s26  ;;  %p917_p12 = scmp.lt.s32.totalorder %s911_s26, %s911_s26 }
  0x1b   :  { %p918_p13 = por %p917_p12, %p916_p11 }
  0x1d   :  { %p919_p0 = pnand %p918_p13, %p912_p10 }
  0x1f   :  { %922 = shalt.err (!%p919_p0)
}
  0x20   :  { %43 = dma.hbm_to_vmem [thread:$0]  %s969_s2, 128, %s41_s25, [#allocation5]  }
  0x21   :  { %923 = dma.done.wait [#allocation3], 256  }
  0x22   :  { %924 = vsyncadd [#allocation3], 4294967040 }
  0x23   :  { %925 = dma.done.wait [#allocation5], 10368  }
  0x24   :  { %926 = vsyncadd [#allocation5], 4294956928  ;;  %v70_v0 = vld [vmem:[#allocation4 + $0x78] sm:$0xff]  ;;  %v69_v1 = vld [vmem:[#allocation4 + $0x70] sm:$0xff]  ;;  %vm577_vm0 = vcmask 7168  }
  0x25   :  { %683 = vmatprep.subr.mxu0 %v70_v0  ;;  %v68_v2 = vld [vmem:[#allocation4 + $0x68] sm:$0xff]  ;;  %v67_v3 = vld [vmem:[#allocation4 + $0x60] sm:$0xff]  ;;  %v53_v4 = vld [vmem:[#allocation2] sm:$0xff] }
  0x26   :  { %684 = vmatpush3.msra.mxu0 %v70_v0  ;;  %v66_v5 = vld [vmem:[#allocation4 + $0x58] sm:$0xff]  ;;  %715 = vmatprep.mubr.f32.mxu0 %v53_v4  ;;  %v170_v7 = vld [vmem:[#allocation4 + $0xf0] sm:$0xff]  ;;  %v169_v9 = vld [vmem:[#allocation4 + $0xe8] sm:$0xff] }
  0x27   :  { %685 = vmatprep.subr.mxu0 %v69_v1  ;;  %v171_v6 = vld [vmem:[#allocation4 + $0xf8] sm:$0xff]  ;;  %v65_v8 = vld [vmem:[#allocation4 + $0x50] sm:$0xff]  ;;  %v64_v10 = vld [vmem:[#allocation4 + $0x48] sm:$0xff] }
  0x28   :  { %686 = vmatpush3.msra.mxu0 %v69_v1  ;;  %718 = vmatprep.subr.mxu1 %v171_v6  ;;  %v168_v11 = vld [vmem:[#allocation4 + $0xe0] sm:$0xff]  ;;  %v167_v13 = vld [vmem:[#allocation4 + $0xd8] sm:$0xff]  ;;  %v166_v15 = vld [vmem:[#allocation4 + $0xd0] sm:$0xff] }
  0x29   :  { %687 = vmatprep.subr.mxu0 %v68_v2  ;;  %719 = vmatpush3.msra.mxu1 %v171_v6  ;;  %v63_v12 = vld [vmem:[#allocation4 + $0x40] sm:$0xff]  ;;  %v62_v14 = vld [vmem:[#allocation4 + $0x38] sm:$0xff]  ;;  %v61_v16 = vld [vmem:[#allocation4 + $0x30] sm:$0xff] }
  0x2a   :  { %688 = vmatpush3.msra.mxu0 %v68_v2  ;;  %720 = vmatprep.subr.mxu1 %v170_v7  ;;  %v165_v17 = vld [vmem:[#allocation4 + $0xc8] sm:$0xff]  ;;  %v164_v19 = vld [vmem:[#allocation4 + $0xc0] sm:$0xff]  ;;  %v163_v21 = vld [vmem:[#allocation4 + $0xb8] sm:$0xff] }
  0x2b   :  { %689 = vmatprep.subr.mxu0 %v67_v3  ;;  %721 = vmatpush3.msra.mxu1 %v170_v7  ;;  %v60_v18 = vld [vmem:[#allocation4 + $0x28] sm:$0xff]  ;;  %v59_v20 = vld [vmem:[#allocation4 + $0x20] sm:$0xff]  ;;  %v58_v22 = vld [vmem:[#allocation4 + $0x18] sm:$0xff] }
  0x2c   :  { %690 = vmatpush3.msra.mxu0 %v67_v3  ;;  %722 = vmatprep.subr.mxu1 %v169_v9  ;;  %v162_v23 = vld [vmem:[#allocation4 + $0xb0] sm:$0xff]  ;;  %v161_v25 = vld [vmem:[#allocation4 + $0xa8] sm:$0xff]  ;;  %v55_v27 = vld [vmem:[#allocation4] sm:$0xff] }
  0x2d   :  { %691 = vmatprep.subr.mxu0 %v66_v5  ;;  %723 = vmatpush3.msra.mxu1 %v169_v9  ;;  %v57_v24 = vld [vmem:[#allocation4 + $0x10] sm:$0xff]  ;;  %v56_v26 = vld [vmem:[#allocation4 + $0x8] sm:$0xff]  ;;  %v54_v28 = vld [vmem:[#allocation2 + $0x8] sm:$0xff] }
  0x2e   :  { %692 = vmatpush3.msra.mxu0 %v66_v5  ;;  %724 = vmatprep.subr.mxu1 %v168_v11  ;;  %v160_v29 = vld [vmem:[#allocation4 + $0xa0] sm:$0xff]  ;;  %v159_v30 = vld [vmem:[#allocation4 + $0x98] sm:$0xff]  ;;  %v158_v31 = vld [vmem:[#allocation4 + $0x90] sm:$0xff] }
  0x2f   :  { %693 = vmatprep.subr.mxu0 %v65_v8  ;;  %725 = vmatpush3.msra.mxu1 %v168_v11  ;;  %v157_v32 = vld [vmem:[#allocation4 + $0x88] sm:$0xff]  ;;  %v156_v33 = vld [vmem:[#allocation4 + $0x80] sm:$0xff]  ;;  %v272_v34 = vld [vmem:[#allocation4 + $0x178] sm:$0xff] }
  0x30   :  { %694 = vmatpush3.msra.mxu0 %v65_v8  ;;  %726 = vmatprep.subr.mxu1 %v167_v13  ;;  %v271_v35 = vld [vmem:[#allocation4 + $0x170] sm:$0xff]  ;;  %v270_v36 = vld [vmem:[#allocation4 + $0x168] sm:$0xff]  ;;  %v269_v37 = vld [vmem:[#allocation4 + $0x160] sm:$0xff] }
  0x31   :  { %695 = vmatprep.subr.mxu0 %v64_v10  ;;  %727 = vmatpush3.msra.mxu1 %v167_v13  ;;  %v268_v38 = vld [vmem:[#allocation4 + $0x158] sm:$0xff]  ;;  %v267_v39 = vld [vmem:[#allocation4 + $0x150] sm:$0xff]  ;;  %v266_v40 = vld [vmem:[#allocation4 + $0x148] sm:$0xff] }
  0x32   :  { %696 = vmatpush3.msra.mxu0 %v64_v10  ;;  %728 = vmatprep.subr.mxu1 %v166_v15  ;;  %v265_v41 = vld [vmem:[#allocation4 + $0x140] sm:$0xff]  ;;  %v264_v42 = vld [vmem:[#allocation4 + $0x138] sm:$0xff]  ;;  %v263_v43 = vld [vmem:[#allocation4 + $0x130] sm:$0xff] }
  0x33   :  { %697 = vmatprep.subr.mxu0 %v63_v12  ;;  %729 = vmatpush3.msra.mxu1 %v166_v15  ;;  %v262_v44 = vld [vmem:[#allocation4 + $0x128] sm:$0xff]  ;;  %v586_v45 = vld [vmem:[#allocation6] ss:$0 sm:$0xff]  ;;  %v260_v55 = vld [vmem:[#allocation4 + $0x118] sm:$0xff] }
  0x34   :  { %698 = vmatpush3.msra.mxu0 %v63_v12  ;;  %730 = vmatprep.subr.mxu1 %v165_v17  ;;  %v261_v54 = vld [vmem:[#allocation4 + $0x120] sm:$0xff]  ;;  %v259_v56 = vld [vmem:[#allocation4 + $0x110] sm:$0xff]  ;;  %v258_v57 = vld [vmem:[#allocation4 + $0x108] sm:$0xff] }
  0x35   :  { %699 = vmatprep.subr.mxu0 %v62_v14  ;;  %731 = vmatpush3.msra.mxu1 %v165_v17  ;;  %v257_v58 = vld [vmem:[#allocation4 + $0x100] sm:$0xff]  ;;  %v373_v59 = vld [vmem:[#allocation4 + $0x1f8] sm:$0xff]  ;;  %v372_v60 = vld [vmem:[#allocation4 + $0x1f0] sm:$0xff] }
  0x36   :  { %700 = vmatpush3.msra.mxu0 %v62_v14  ;;  %732 = vmatprep.subr.mxu1 %v164_v19  ;;  %v371_v61 = vld [vmem:[#allocation4 + $0x1e8] sm:$0xff]  ;;  %v370_v62 = vld [vmem:[#allocation4 + $0x1e0] sm:$0xff]  ;;  %v369_v63 = vld [vmem:[#allocation4 + $0x1d8] sm:$0xff] }
  0x37   :  { %701 = vmatprep.subr.mxu0 %v61_v16  ;;  %733 = vmatpush3.msra.mxu1 %v164_v19  ;;  %v368_v0 = vld [vmem:[#allocation4 + $0x1d0] sm:$0xff]  ;;  %v367_v1 = vld [vmem:[#allocation4 + $0x1c8] sm:$0xff]  ;;  %v366_v2 = vld [vmem:[#allocation4 + $0x1c0] sm:$0xff] }
  0x38   :  { %702 = vmatpush3.msra.mxu0 %v61_v16  ;;  %734 = vmatprep.subr.mxu1 %v163_v21  ;;  %v365_v3 = vld [vmem:[#allocation4 + $0x1b8] sm:$0xff]  ;;  %v364_v4 = vld [vmem:[#allocation4 + $0x1b0] sm:$0xff]  ;;  %v363_v5 = vld [vmem:[#allocation4 + $0x1a8] sm:$0xff] }
  0x39   :  { %703 = vmatprep.subr.mxu0 %v60_v18  ;;  %735 = vmatpush3.msra.mxu1 %v163_v21  ;;  %v587_v6 = vld [vmem:[#allocation6 + $0x1] ss:$0 sm:$0xff]  ;;  %v361_v16 = vld [vmem:[#allocation4 + $0x198] sm:$0xff]  ;;  %v360_v17 = vld [vmem:[#allocation4 + $0x190] sm:$0xff] }
  0x3a   :  { %704 = vmatpush3.msra.mxu0 %v60_v18  ;;  %736 = vmatprep.subr.mxu1 %v162_v23  ;;  %v362_v15 = vld [vmem:[#allocation4 + $0x1a0] sm:$0xff]  ;;  %v359_v18 = vld [vmem:[#allocation4 + $0x188] sm:$0xff]  ;;  %v473_v21 = vld [vmem:[#allocation4 + $0x270] sm:$0xff] }
  0x3b   :  { %705 = vmatprep.subr.mxu0 %v59_v20  ;;  %737 = vmatpush3.msra.mxu1 %v162_v23  ;;  %v358_v19 = vld [vmem:[#allocation4 + $0x180] sm:$0xff] }
  0x3c   :  { %706 = vmatpush3.msra.mxu0 %v59_v20  ;;  %738 = vmatprep.subr.mxu1 %v161_v25  ;;  %v474_v20 = vld [vmem:[#allocation4 + $0x278] sm:$0xff]  ;;  %v471_v23 = vld [vmem:[#allocation4 + $0x260] sm:$0xff] }
  0x3d   :  { %707 = vmatprep.subr.mxu0 %v58_v22  ;;  %739 = vmatpush3.msra.mxu1 %v161_v25  ;;  %v469_v25 = vld [vmem:[#allocation4 + $0x250] sm:$0xff] }
  0x3e   :  { %708 = vmatpush3.msra.mxu0 %v58_v22  ;;  %740 = vmatprep.subr.mxu1 %v160_v29  ;;  %v472_v22 = vld [vmem:[#allocation4 + $0x268] sm:$0xff] }
  0x3f   :  { %709 = vmatprep.subr.mxu0 %v57_v24  ;;  %741 = vmatpush3.msra.mxu1 %v160_v29  ;;  %v465_v29 = vld [vmem:[#allocation4 + $0x230] sm:$0xff] }
  0x40   :  { %710 = vmatpush3.msra.mxu0 %v57_v24  ;;  %742 = vmatprep.subr.mxu1 %v159_v30  ;;  %v470_v24 = vld [vmem:[#allocation4 + $0x258] sm:$0xff] }
  0x41   :  { %711 = vmatprep.subr.mxu0 %v56_v26  ;;  %743 = vmatpush3.msra.mxu1 %v159_v30  ;;  %v464_v30 = vld [vmem:[#allocation4 + $0x228] sm:$0xff] }
  0x42   :  { %712 = vmatpush3.msra.mxu0 %v56_v26  ;;  %744 = vmatprep.subr.mxu1 %v158_v31  ;;  %v468_v26 = vld [vmem:[#allocation4 + $0x248] sm:$0xff] }
  0x43   :  { %713 = vmatprep.subr.mxu0 %v55_v27  ;;  %745 = vmatpush3.msra.mxu1 %v158_v31  ;;  %v588_v31 = vld [vmem:[#allocation6 + $0x2] ss:$0 sm:$0xff] }
  0x44   :  { %714 = vmatpush3.msra.mxu0 %v55_v27  ;;  %746 = vmatprep.subr.mxu1 %v157_v32  ;;  %v467_v27 = vld [vmem:[#allocation4 + $0x240] sm:$0xff] }
  0x45   :  { %716 = vmatmul.mubr.f32.vlgmr.msra.gmra.mxu0 %v54_v28  ;;  %747 = vmatpush3.msra.mxu1 %v157_v32  ;;  %v466_v28 = vld [vmem:[#allocation4 + $0x238] sm:$0xff] }
  0x46   :  { %748 = vmatprep.subr.mxu1 %v156_v33  ;;  %753 = vmatprep.subr.mxu0 %v272_v34 }
  0x47   :  { %749 = vmatpush3.msra.mxu1 %v156_v33  ;;  %754 = vmatpush3.msra.mxu0 %v272_v34 }
  0x48   :  { %755 = vmatprep.subr.mxu0 %v271_v35  ;;  %788 = vmatprep.subr.mxu1 %v373_v59 }
  0x49   :  { %756 = vmatpush3.msra.mxu0 %v271_v35 }
  0x4a   :  { %757 = vmatprep.subr.mxu0 %v270_v36 }
  0x4b   :  { %758 = vmatpush3.msra.mxu0 %v270_v36 }
  0x4c   :  { %759 = vmatprep.subr.mxu0 %v269_v37 }
  0x4d   :  { %760 = vmatpush3.msra.mxu0 %v269_v37 }
  0x4e   :  { %761 = vmatprep.subr.mxu0 %v268_v38 }
  0x4f   :  { %762 = vmatpush3.msra.mxu0 %v268_v38 }
  0x50   :  { %763 = vmatprep.subr.mxu0 %v267_v39 }
  0x51   :  { %764 = vmatpush3.msra.mxu0 %v267_v39 }
  0x52   :  { %765 = vmatprep.subr.mxu0 %v266_v40 }
  0x53   :  { %766 = vmatpush3.msra.mxu0 %v266_v40  ;;  %v463_v40 = vld [vmem:[#allocation4 + $0x220] sm:$0xff] }
  0x54   :  { %767 = vmatprep.subr.mxu0 %v265_v41 }
  0x55   :  { %768 = vmatpush3.msra.mxu0 %v265_v41  ;;  %v462_v41 = vld [vmem:[#allocation4 + $0x218] sm:$0xff] }
  0x56   :  { %769 = vmatprep.subr.mxu0 %v264_v42 }
  0x57   :  { %770 = vmatpush3.msra.mxu0 %v264_v42  ;;  %v461_v42 = vld [vmem:[#allocation4 + $0x210] sm:$0xff] }
  0x58   :  { %771 = vmatprep.subr.mxu0 %v263_v43 }
  0x59   :  { %772 = vmatpush3.msra.mxu0 %v263_v43  ;;  %v460_v43 = vld [vmem:[#allocation4 + $0x208] sm:$0xff] }
  0x5a   :  { %773 = vmatprep.subr.mxu0 %v262_v44 }
  0x5b   :  { %774 = vmatpush3.msra.mxu0 %v262_v44  ;;  %v459_v44 = vld [vmem:[#allocation4 + $0x200] sm:$0xff] }
  0x5c   :  { %775 = vmatprep.subr.mxu0 %v261_v54 }
  0x5d   :  { %776 = vmatpush3.msra.mxu0 %v261_v54  ;;  %v590_v54 = vld [vmem:[#allocation6 + $0x4] ss:$0 sm:$0xff] }
  0x5e   :  { %777 = vmatprep.subr.mxu0 %v260_v55 }
  0x5f   :  { %778 = vmatpush3.msra.mxu0 %v260_v55 }
  0x60   :  { %779 = vmatprep.subr.mxu0 %v259_v56 }
  0x61   :  { %780 = vmatpush3.msra.mxu0 %v259_v56 }
  0x62   :  { %781 = vmatprep.subr.mxu0 %v258_v57 }
  0x63   :  { %782 = vmatpush3.msra.mxu0 %v258_v57 }
  0x64   :  { %783 = vmatprep.subr.mxu0 %v257_v58 }
  0x65   :  { %784 = vmatpush3.msra.mxu0 %v257_v58 }
  0x66   :  { %823 = vmatprep.subr.mxu0 %v474_v20 }
 0x105   :  { %v717_v46 = vpop.f32.mrf.mxu0 }
 0x106   :  { %v148_v47 = vadd.f32 %v717_v46, %v586_v45 }
 0x107   :  { %v142_v48 = vpop.f32.mrf.mxu0 }
 0x108   :  { %v143_v49 = vadd.f32 %v586_v45, %v142_v48  ;;  %v152_v50 = vmul.f32 0.1, %v148_v47  ;;  %v589_v45 = vld [vmem:[#allocation6 + $0x3] ss:$0 sm:$0xff] }
 0x10a   :  { %v151_v51 = vmul.f32 0.1, %v143_v49  ;;  %v154_v53 = vmax.f32 %v148_v47, %v152_v50 }
 0x10c   :  { %v153_v52 = vmax.f32 %v143_v49, %v151_v51 }
 0x10e   :  { %750 = vmatprep.mubr.f32.mxu1 %v153_v52 }
 0x10f   :  { %751 = vmatmul.mubr.f32.vlgmr.msra.gmra.mxu1 %v154_v53 }
 0x110   :  { %789 = vmatpush3.msra.mxu1 %v373_v59 }
 0x111   :  { %790 = vmatprep.subr.mxu1 %v372_v60 }
 0x112   :  { %791 = vmatpush3.msra.mxu1 %v372_v60 }
 0x113   :  { %792 = vmatprep.subr.mxu1 %v371_v61 }
 0x114   :  { %793 = vmatpush3.msra.mxu1 %v371_v61 }
 0x115   :  { %794 = vmatprep.subr.mxu1 %v370_v62 }
 0x116   :  { %795 = vmatpush3.msra.mxu1 %v370_v62  ;;  %v591_v62 = vld [vmem:[#allocation6 + $0x5] ss:$0 sm:$0xff] }
 0x117   :  { %796 = vmatprep.subr.mxu1 %v369_v63 }
 0x118   :  { %797 = vmatpush3.msra.mxu1 %v369_v63 }
 0x119   :  { %798 = vmatprep.subr.mxu1 %v368_v0 }
 0x11a   :  { %799 = vmatpush3.msra.mxu1 %v368_v0 }
 0x11b   :  { %800 = vmatprep.subr.mxu1 %v367_v1 }
 0x11c   :  { %801 = vmatpush3.msra.mxu1 %v367_v1 }
 0x11d   :  { %802 = vmatprep.subr.mxu1 %v366_v2 }
 0x11e   :  { %803 = vmatpush3.msra.mxu1 %v366_v2  ;;  %v592_v2 = vld [vmem:[#allocation6 + $0x6] ss:$0 sm:$0xff] }
 0x11f   :  { %804 = vmatprep.subr.mxu1 %v365_v3 }
 0x120   :  { %805 = vmatpush3.msra.mxu1 %v365_v3 }
 0x121   :  { %806 = vmatprep.subr.mxu1 %v364_v4 }
 0x122   :  { %807 = vmatpush3.msra.mxu1 %v364_v4 }
 0x123   :  { %808 = vmatprep.subr.mxu1 %v363_v5 }
 0x124   :  { %809 = vmatpush3.msra.mxu1 %v363_v5 }
 0x125   :  { %810 = vmatprep.subr.mxu1 %v362_v15 }
 0x126   :  { %811 = vmatpush3.msra.mxu1 %v362_v15 }
 0x127   :  { %812 = vmatprep.subr.mxu1 %v361_v16 }
 0x128   :  { %813 = vmatpush3.msra.mxu1 %v361_v16 }
 0x129   :  { %814 = vmatprep.subr.mxu1 %v360_v17 }
 0x12a   :  { %815 = vmatpush3.msra.mxu1 %v360_v17 }
 0x12b   :  { %816 = vmatprep.subr.mxu1 %v359_v18 }
 0x12c   :  { %817 = vmatpush3.msra.mxu1 %v359_v18 }
 0x12d   :  { %818 = vmatprep.subr.mxu1 %v358_v19 }
 0x12e   :  { %819 = vmatpush3.msra.mxu1 %v358_v19 }
 0x1cf   :  { %v752_v7 = vpop.f32.mrf.mxu1 }
 0x1d0   :  { %v249_v8 = vadd.f32 %v752_v7, %v587_v6 }
 0x1d1   :  { %v243_v9 = vpop.f32.mrf.mxu1 }
 0x1d2   :  { %v244_v10 = vadd.f32 %v587_v6, %v243_v9  ;;  %v253_v11 = vmul.f32 0.1, %v249_v8 }
 0x1d4   :  { %v252_v12 = vmul.f32 0.1, %v244_v10  ;;  %v255_v14 = vmax.f32 %v249_v8, %v253_v11 }
 0x1d6   :  { %v254_v13 = vmax.f32 %v244_v10, %v252_v12 }
 0x1d8   :  { %785 = vmatprep.mubr.f32.mxu0 %v254_v13 }
 0x1d9   :  { %786 = vmatmul.mubr.f32.vlgmr.msra.gmra.mxu0 %v255_v14 }
 0x1da   :  { %824 = vmatpush3.msra.mxu0 %v474_v20 }
 0x1db   :  { %825 = vmatprep.subr.mxu0 %v473_v21 }
 0x1dc   :  { %826 = vmatpush3.msra.mxu0 %v473_v21 }
 0x1dd   :  { %827 = vmatprep.subr.mxu0 %v472_v22 }
 0x1de   :  { %828 = vmatpush3.msra.mxu0 %v472_v22 }
 0x1df   :  { %829 = vmatprep.subr.mxu0 %v471_v23 }
 0x1e0   :  { %830 = vmatpush3.msra.mxu0 %v471_v23 }
 0x1e1   :  { %831 = vmatprep.subr.mxu0 %v470_v24 }
 0x1e2   :  { %832 = vmatpush3.msra.mxu0 %v470_v24 }
 0x1e3   :  { %833 = vmatprep.subr.mxu0 %v469_v25 }
 0x1e4   :  { %834 = vmatpush3.msra.mxu0 %v469_v25 }
 0x1e5   :  { %835 = vmatprep.subr.mxu0 %v468_v26 }
 0x1e6   :  { %836 = vmatpush3.msra.mxu0 %v468_v26 }
 0x1e7   :  { %837 = vmatprep.subr.mxu0 %v467_v27 }
 0x1e8   :  { %838 = vmatpush3.msra.mxu0 %v467_v27 }
 0x1e9   :  { %839 = vmatprep.subr.mxu0 %v466_v28 }
 0x1ea   :  { %840 = vmatpush3.msra.mxu0 %v466_v28 }
 0x1eb   :  { %841 = vmatprep.subr.mxu0 %v465_v29 }
 0x1ec   :  { %842 = vmatpush3.msra.mxu0 %v465_v29 }
 0x1ed   :  { %843 = vmatprep.subr.mxu0 %v464_v30 }
 0x1ee   :  { %844 = vmatpush3.msra.mxu0 %v464_v30 }
 0x1ef   :  { %845 = vmatprep.subr.mxu0 %v463_v40 }
 0x1f0   :  { %846 = vmatpush3.msra.mxu0 %v463_v40 }
 0x1f1   :  { %847 = vmatprep.subr.mxu0 %v462_v41 }
 0x1f2   :  { %848 = vmatpush3.msra.mxu0 %v462_v41 }
 0x1f3   :  { %849 = vmatprep.subr.mxu0 %v461_v42 }
 0x1f4   :  { %850 = vmatpush3.msra.mxu0 %v461_v42 }
 0x1f5   :  { %851 = vmatprep.subr.mxu0 %v460_v43 }
 0x1f6   :  { %852 = vmatpush3.msra.mxu0 %v460_v43 }
 0x1f7   :  { %853 = vmatprep.subr.mxu0 %v459_v44 }
 0x1f8   :  { %854 = vmatpush3.msra.mxu0 %v459_v44 }
 0x299   :  { %v787_v32 = vpop.f32.mrf.mxu0 }
 0x29a   :  { %v350_v33 = vadd.f32 %v787_v32, %v588_v31 }
 0x29b   :  { %v344_v34 = vpop.f32.mrf.mxu0 }
 0x29c   :  { %v345_v35 = vadd.f32 %v588_v31, %v344_v34  ;;  %v354_v36 = vmul.f32 0.1, %v350_v33 }
 0x29e   :  { %v353_v37 = vmul.f32 0.1, %v345_v35  ;;  %v356_v39 = vmax.f32 %v350_v33, %v354_v36 }
 0x2a0   :  { %v355_v38 = vmax.f32 %v345_v35, %v353_v37 }
 0x2a2   :  { %820 = vmatprep.mubr.f32.mxu1 %v355_v38 }
 0x2a3   :  { %821 = vmatmul.mubr.f32.vlgmr.msra.gmra.mxu1 %v356_v39 }
 0x363   :  { %v822_v46 = vpop.f32.mrf.mxu1 }
 0x364   :  { %v451_v47 = vadd.f32 %v822_v46, %v589_v45 }
 0x365   :  { %v445_v48 = vpop.f32.mrf.mxu1 }
 0x366   :  { %v446_v49 = vadd.f32 %v589_v45, %v445_v48  ;;  %v455_v50 = vmul.f32 0.1, %v451_v47 }
 0x368   :  { %v454_v51 = vmul.f32 0.1, %v446_v49  ;;  %v457_v53 = vmax.f32 %v451_v47, %v455_v50 }
 0x36a   :  { %v456_v52 = vmax.f32 %v446_v49, %v454_v51 }
 0x36c   :  { %855 = vmatprep.mubr.f32.mxu0 %v456_v52 }
 0x36d   :  { %856 = vmatmul.mubr.f32.vlgmr.msra.gmra.mxu0 %v457_v53 }
 0x42d   :  { %v857_v55 = vpop.f32.mrf.mxu0 }
 0x42e   :  { %v552_v56 = vadd.f32 %v857_v55, %v590_v54 }
 0x42f   :  { %v546_v57 = vpop.f32.mrf.mxu0 }
 0x430   :  { %v547_v58 = vadd.f32 %v590_v54, %v546_v57  ;;  %v556_v59 = vmul.f32 0.1, %v552_v56 }
 0x432   :  { %v555_v60 = vmul.f32 0.1, %v547_v58  ;;  %v558_v63 = vmax.f32 %v552_v56, %v556_v59 }
 0x434   :  { %v557_v61 = vmax.f32 %v547_v58, %v555_v60  ;;  %v566_v1 = vmul.f32 %v591_v62, %v558_v63 }
 0x436   :  { %v565_v0 = vmul.f32 %v591_v62, %v557_v61 }
 0x438   :  { %567 = vadd.xlane.f32.xlu0 %v565_v0 }
 0x43c   :  { %569 = vadd.xlane.f32.xlu0 %v566_v1 }
 0x4c1   :  { %v568_v3 = vpop.xlane.xlu0 %567 }
 0x4c2   :  { %v575_v4 = vadd.f32 %v592_v2, %v568_v3 }
 0x4c4   :  { %578 = vst.msk [vmem:[%s970_s3] sm:$0xff] %vm577_vm0, %v575_v4 }
 0x4c5   :  { %v570_v5 = vpop.xlane.xlu0 %569 }
 0x4c6   :  { %v576_v6 = vadd.f32 %v592_v2, %v570_v5 }
 0x4c8   :  { %579 = vst.msk [vmem:[%s970_s3 + $0x8] sm:$0xff] %vm577_vm0, %v576_v6 }
 0x4c9   :  { %584 = vsyncpa [#allocation3], 1 }
 0x4ca   :  { %585 = vsyncpa [#allocation5], 1 }

</bundles_post_ra>
